<compile_context>
chip_gen: v5e
topology: v5e:2x2
jax: 0.10.0
libtpu: 0.0.40
codegen_flags: <defaults>
</compile_context>

<pallas_src>
import jax
import jax.numpy as jnp
from jax import lax
from jax.experimental import pallas as pl
from jax.experimental.pallas import tpu as pltpu

_LANE = 128
_CHUNK_ROWS = 512             # strip-mine chunk inside a block (64 f32 vregs)
_MAX_ROWS_PER_BLOCK = 8192    # 4 MiB f32 per input per block
_SINGLE_BLOCK_ROWS = 4096     # below this, one full-extent block is enough
_VMEM_LIMIT_BYTES = 48 * 1024 * 1024


def _round_up(x, m):
    return ((x + m - 1) // m) * m


def _sublane_multiple(dtype):
    # Native sublane tile: 8 rows for 4-byte dtypes, 16 for 2-byte, 32 for 1-byte.
    return 8 * max(1, 4 // jnp.dtype(dtype).itemsize)


def _nbytes(x):
    return int(x.size) * jnp.dtype(x.dtype).itemsize


def _make_mse_kernel(rows_per_block, n_rows_valid, mask_is_indicator):
    """Builds the per-block kernel (all tiling parameters are static)."""
    ragged = (n_rows_valid % rows_per_block) != 0

    # Static chunk schedule covering the block.  This is a full unroll with
    # static slice offsets; each chunk is reduced into the accumulator right
    # away, so live temporaries stay at ~a chunk's worth of vregs.
    chunks = []
    r0 = 0
    while r0 < rows_per_block:
        n = min(_CHUNK_ROWS, rows_per_block - r0)
        chunks.append((r0, n))
        r0 += n

    def kernel(pred_ref, tgt_ref, mask_ref, num_ref, den_ref):
        block_row0 = pl.program_id(0) * rows_per_block  # rows consumed so far

        def chunk_sums(row0, nrows):
            sl = pl.ds(row0, nrows)
            p = pred_ref[sl, :].astype(jnp.float32)
            t = tgt_ref[sl, :].astype(jnp.float32)
            r = p - t
            r2 = r * r
            m = mask_ref[sl, :]
            if mask_is_indicator:
                # {0,1} indicator mask: compare+select, no convert+mul chain.
                keep = m != 0
                num_e = jnp.where(keep, r2, 0.0)
                den_e = keep.astype(jnp.float32)
            else:
                # Arbitrary numeric weights: faithful to torch's mask * res^2.
                mf = m.astype(jnp.float32)
                num_e = mf * r2
                den_e = mf
            if ragged:
                # Rows past n_rows_valid in the last block hold unspecified
                # data (possibly NaN) -> drop them with a select, never a mul.
                rid = lax.broadcasted_iota(jnp.int32, (nrows, _LANE), 0)
                ok = rid < (n_rows_valid - (block_row0 + row0))
                num_e = jnp.where(ok, num_e, 0.0)
                den_e = jnp.where(ok, den_e, 0.0)
            return (jnp.sum(num_e, axis=0, keepdims=True),
                    jnp.sum(den_e, axis=0, keepdims=True))

        num_acc = jnp.zeros((1, _LANE), jnp.float32)
        den_acc = jnp.zeros((1, _LANE), jnp.float32)
        for row0, nrows in chunks:   # static full unroll (<= 16 chunks)
            dn, dd = chunk_sums(row0, nrows)
            num_acc = num_acc + dn
            den_acc = den_acc + dd

        num_ref[...] = num_acc.reshape(1, 1, _LANE)
        den_ref[...] = den_acc.reshape(1, 1, _LANE)

    return kernel


def mse_loss_pallas(prediction, target, mask, *, block_rows=None):
    """Masked MSE loss with batch-based reduction (matches PyTorch MSELoss)."""
    assert prediction.shape == target.shape == mask.shape
    total = int(prediction.size)
    if total == 0:
        return jnp.float32(0.0)

    # Bool masks: shipped as int8 (1 B/elem; lax.bitcast_convert_type rejects
    # bool so this narrow convert is the minimal safe option).  Numeric masks
    # pass through untouched (zero extra HBM traffic).
    mask_is_indicator = mask.dtype == jnp.bool_
    if mask_is_indicator:
        mask = mask.astype(jnp.int8)

    # Lane-dense (n_rows, 128) slab.  Reshape is free when numel % 128 == 0;
    # otherwise pad the flat arrays by < 128 zeros (mask pad 0 -> no effect).
    rem = total % _LANE

    def to_slab(x):
        flat = x.reshape(-1)
        if rem:
            flat = jnp.pad(flat, (0, _LANE - rem))
        return flat.reshape(-1, _LANE)

    pred2, tgt2, mask2 = to_slab(prediction), to_slab(target), to_slab(mask)
    n_rows = pred2.shape[0]

    # Block-row policy: a single full-extent block for small inputs (always a
    # legal layout); otherwise >= 2 blocks (keeps both v7x TensorCores
    # streaming HBM), rounded to the strip-mine chunk, capped at 8192 rows.
    row_align = max(_sublane_multiple(x.dtype) for x in (pred2, tgt2, mask2))
    if block_rows is not None:
        assert block_rows > 0 and block_rows % row_align == 0, (
            f"block_rows must be a positive multiple of {row_align} "
            f"for dtypes {prediction.dtype}/{target.dtype}/{mask2.dtype}")
        rows_per_block = min(block_rows, n_rows)
    elif n_rows <= _SINGLE_BLOCK_ROWS:
        rows_per_block = n_rows
    else:
        rows_per_block = min(_MAX_ROWS_PER_BLOCK,
                             _round_up(pl.cdiv(n_rows, 2), _CHUNK_ROWS))
    n_blocks = pl.cdiv(n_rows, rows_per_block)

    kernel = _make_mse_kernel(rows_per_block, n_rows, mask_is_indicator)

    in_spec = pl.BlockSpec((rows_per_block, _LANE), lambda g: (g, 0))
    out_spec = pl.BlockSpec((1, 1, _LANE), lambda g: (g, 0, 0))

    cost = pl.CostEstimate(
        flops=5 * total,
        transcendentals=0,
        bytes_accessed=_nbytes(pred2) + _nbytes(tgt2) + _nbytes(mask2)
        + 2 * n_blocks * _LANE * 4,
    )

    num, den = pl.pallas_call(
        kernel,
        out_shape=(
            jax.ShapeDtypeStruct((n_blocks, 1, _LANE), jnp.float32),
            jax.ShapeDtypeStruct((n_blocks, 1, _LANE), jnp.float32),
        ),
        grid_spec=pltpu.PrefetchScalarGridSpec(
            num_scalar_prefetch=0,
            grid=(n_blocks,),
            in_specs=[in_spec, in_spec, in_spec],
            out_specs=[out_spec, out_spec],
        ),
        compiler_params=pltpu.CompilerParams(
            dimension_semantics=("parallel",),  # independent per-block partials
            vmem_limit_bytes=_VMEM_LIMIT_BYTES,
        ),
        cost_estimate=cost,
    )(pred2, tgt2, mask2)

    num_s = jnp.sum(num)
    den_s = jnp.sum(den)            # == sum(M); PyTorch divides by sum(2*M)
    divisor = 2.0 * den_s
    safe = jnp.where(divisor == 0.0, jnp.float32(1.0), divisor)
    return jnp.where(divisor == 0.0, jnp.float32(0.0), num_s / safe)


def mse_loss_ref(prediction, target, mask):
    """Pure-JAX reference mirroring the PyTorch code."""
    p = prediction.astype(jnp.float32)
    t = target.astype(jnp.float32)
    m = mask.astype(jnp.float32)
    M = jnp.sum(m, axis=(1, 2))
    res = p - t
    image_loss = jnp.sum(m * res * res, axis=(1, 2))
    divisor = jnp.sum(2.0 * M)
    safe = jnp.where(divisor == 0.0, jnp.float32(1.0), divisor)
    return jnp.where(divisor == 0.0, jnp.float32(0.0),
                     jnp.sum(image_loss) / safe)


if __name__ == "__main__":
    # 1) Small single-block case, float {0,1} mask (zero-copy mask path).
    k1, k2, k3 = jax.random.split(jax.random.PRNGKey(0), 3)
    B, H, W = 2, 16, 16
    pred = jax.random.normal(k1, (B, H, W), jnp.float32)
    tgt = jax.random.normal(k2, (B, H, W), jnp.float32)
    maskf = (jax.random.uniform(k3, (B, H, W)) > 0.3).astype(jnp.float32)
    out = jax.block_until_ready(mse_loss_pallas(pred, tgt, maskf))
    ref = mse_loss_ref(pred, tgt, maskf)
    assert jnp.allclose(out, ref, rtol=1e-5, atol=1e-6), (out, ref)

    # 2) Multi-block grid with a ragged last block + bool mask (int8 on the wire).
    k4, k5, k6 = jax.random.split(jax.random.PRNGKey(1), 3)
    B2, H2, W2 = 2, 32, 96               # 6144 elems -> 48 slab rows
    p2 = jax.random.normal(k4, (B2, H2, W2), jnp.float32)
    t2 = jax.random.normal(k5, (B2, H2, W2), jnp.float32)
    m2 = jax.random.uniform(k6, (B2, H2, W2)) > 0.5
    out2 = jax.block_until_ready(mse_loss_pallas(p2, t2, m2, block_rows=32))
    ref2 = mse_loss_ref(p2, t2, m2)
    assert jnp.allclose(out2, ref2, rtol=1e-5, atol=1e-6), (out2, ref2)

    # 3) numel not a multiple of 128 (minimal-pad fallback) + bf16 inputs.
    k7, k8, k9 = jax.random.split(jax.random.PRNGKey(2), 3)
    B3, H3, W3 = 2, 15, 17
    p3 = jax.random.normal(k7, (B3, H3, W3), jnp.float32).astype(jnp.bfloat16)
    t3 = jax.random.normal(k8, (B3, H3, W3), jnp.float32).astype(jnp.bfloat16)
    m3 = (jax.random.uniform(k9, (B3, H3, W3)) > 0.4).astype(jnp.float32)
    out3 = jax.block_until_ready(mse_loss_pallas(p3, t3, m3))
    ref3 = mse_loss_ref(p3, t3, m3)
    assert jnp.allclose(out3, ref3, rtol=1e-4, atol=1e-5), (out3, ref3)

    # 4) all-zero mask -> guarded divide returns 0 (matches torch's `if divisor == 0`).
    zmask = jnp.zeros((B, H, W), jnp.float32)
    out4 = jax.block_until_ready(mse_loss_pallas(pred, tgt, zmask))
    assert jnp.allclose(out4, 0.0), out4

    print("KERNEL_OK")
</pallas_src>

<mosaic_0001>
module attributes {stable_mosaic.version = 11 : i64} {
  func.func @kernel(%arg0: i32, %arg1: memref<4x128xf32, #tpu.memory_space<vmem>>, %arg2: memref<4x128xf32, #tpu.memory_space<vmem>>, %arg3: memref<4x128xf32, #tpu.memory_space<vmem>>, %arg4: memref<1x1x128xf32, #tpu.memory_space<vmem>>, %arg5: memref<1x1x128xf32, #tpu.memory_space<vmem>>) attributes {dimension_semantics = [#tpu.dimension_semantics<parallel>], iteration_bounds = array<i64: 1>, scalar_prefetch = 0 : i64, scratch_operands = 0 : i64, tpu.core_type = #tpu.core_type<tc>, window_params = [{transform_indices = @transform_0, window_bounds = array<i64: 4, 128>}, {transform_indices = @transform_1, window_bounds = array<i64: 4, 128>}, {transform_indices = @transform_2, window_bounds = array<i64: 4, 128>}, {transform_indices = @transform_3, window_bounds = array<i64: 1, 1, 128>}, {transform_indices = @transform_4, window_bounds = array<i64: 1, 1, 128>}]} {
    %cst = arith.constant 0.000000e+00 : f32
    %0 = vector.broadcast %cst : f32 to vector<1x128xf32>
    %cst_0 = arith.constant 0.000000e+00 : f32
    %1 = vector.broadcast %cst_0 : f32 to vector<1x128xf32>
    %c0 = arith.constant 0 : index
    %c0_1 = arith.constant 0 : index
    %2 = vector.load %arg1[%c0, %c0_1] : memref<4x128xf32, #tpu.memory_space<vmem>>, vector<4x128xf32>
    %c0_2 = arith.constant 0 : index
    %c0_3 = arith.constant 0 : index
    %3 = vector.load %arg2[%c0_2, %c0_3] : memref<4x128xf32, #tpu.memory_space<vmem>>, vector<4x128xf32>
    %4 = arith.subf %2, %3 : vector<4x128xf32>
    %5 = arith.mulf %4, %4 : vector<4x128xf32>
    %c0_4 = arith.constant 0 : index
    %c0_5 = arith.constant 0 : index
    %6 = vector.load %arg3[%c0_4, %c0_5] : memref<4x128xf32, #tpu.memory_space<vmem>>, vector<4x128xf32>
    %7 = arith.mulf %6, %5 : vector<4x128xf32>
    %cst_6 = arith.constant dense<0.000000e+00> : vector<128xf32>
    %8 = vector.multi_reduction <add>, %7, %cst_6 [0] : vector<4x128xf32> to vector<128xf32>
    %9 = vector.shape_cast %8 : vector<128xf32> to vector<1x128xf32>
    %cst_7 = arith.constant dense<0.000000e+00> : vector<128xf32>
    %10 = vector.multi_reduction <add>, %6, %cst_7 [0] : vector<4x128xf32> to vector<128xf32>
    %11 = vector.shape_cast %10 : vector<128xf32> to vector<1x128xf32>
    %12 = arith.addf %0, %9 : vector<1x128xf32>
    %13 = arith.addf %1, %11 : vector<1x128xf32>
    %14 = vector.shape_cast %12 : vector<1x128xf32> to vector<1x1x128xf32>
    %c0_8 = arith.constant 0 : index
    %c0_9 = arith.constant 0 : index
    %c0_10 = arith.constant 0 : index
    %15 = vector.load %arg4[%c0_8, %c0_9, %c0_10] : memref<1x1x128xf32, #tpu.memory_space<vmem>>, vector<1x1x128xf32>
    tpu.vector_store %arg4[%c0_8, %c0_9, %c0_10], %14 {strides = array<i32>} : memref<1x1x128xf32, #tpu.memory_space<vmem>>, vector<1x1x128xf32>,
    %16 = vector.shape_cast %13 : vector<1x128xf32> to vector<1x1x128xf32>
    %c0_11 = arith.constant 0 : index
    %c0_12 = arith.constant 0 : index
    %c0_13 = arith.constant 0 : index
    %17 = vector.load %arg5[%c0_11, %c0_12, %c0_13] : memref<1x1x128xf32, #tpu.memory_space<vmem>>, vector<1x1x128xf32>
    tpu.vector_store %arg5[%c0_11, %c0_12, %c0_13], %16 {strides = array<i32>} : memref<1x1x128xf32, #tpu.memory_space<vmem>>, vector<1x1x128xf32>,
    return
  }
  func.func @transform_0(%arg0: i32) -> (i32, i32) {
    %c0_i32 = arith.constant 0 : i32
    %c0_i32_0 = arith.constant 0 : i32
    return %arg0, %c0_i32 : i32, i32
  }
  func.func @transform_1(%arg0: i32) -> (i32, i32) {
    %c0_i32 = arith.constant 0 : i32
    %c0_i32_0 = arith.constant 0 : i32
    return %arg0, %c0_i32 : i32, i32
  }
  func.func @transform_2(%arg0: i32) -> (i32, i32) {
    %c0_i32 = arith.constant 0 : i32
    %c0_i32_0 = arith.constant 0 : i32
    return %arg0, %c0_i32 : i32, i32
  }
  func.func @transform_3(%arg0: i32) -> (i32, i32, i32) {
    %c0_i32 = arith.constant 0 : i32
    %c0_i32_0 = arith.constant 0 : i32
    %c0_i32_1 = arith.constant 0 : i32
    return %arg0, %c0_i32, %c0_i32_0 : i32, i32, i32
  }
  func.func @transform_4(%arg0: i32) -> (i32, i32, i32) {
    %c0_i32 = arith.constant 0 : i32
    %c0_i32_0 = arith.constant 0 : i32
    %c0_i32_1 = arith.constant 0 : i32
    return %arg0, %c0_i32, %c0_i32_0 : i32, i32, i32
  }
}

</mosaic_0001>

<bundles_post_ra>
// kernel: tpu_custom_call.1
= control target key start
LH: loop header
LB: loop body
LE: loop exit
PB: predicated region body
PF: predicated region fallthrough
CT: control target
= control target key end

     0   :  { %10 = vsyncpa [#allocation3], 0  ;;  %s296_s0 = inlined_call_operand.hbm [shape: f32[4,128], index: 0, kind: input, shape index: {}]   ;;  %s297_s1 = inlined_call_operand.hbm [shape: f32[4,128], index: 1, kind: input, shape index: {}]   ;;  %s298_s2 = inlined_call_operand.hbm [shape: f32[4,128], index: 2, kind: input, shape index: {}]   ;;  %s299_s3 = inlined_call_operand.hbm [shape: f32[1,1,128], index: 3, kind: output, shape index: {0}]   ;;  %s300_s4 = inlined_call_operand.hbm [shape: f32[1,1,128], index: 4, kind: output, shape index: {1}]  }
   0x1   :  { %11 = vsyncpa [#allocation6], 0 }
   0x2   :  { %12 = vsyncpa [#allocation4], 0  ;;  %s30_s17 = sshll.u32 %s297_s1, 4  ;;  %s31_s17 = int_to_ptr.hbm [resolvable:$true] %s30_s17 }
   0x3   :  { %13 = vsyncpa [#allocation10], 0  ;;  %s251_s18 = smov [#allocation5]   ;;  %s19_s22 = sshll.u32 %s296_s0, 4  ;;  %s20_s22 = int_to_ptr.hbm [resolvable:$true] %s19_s22 }
   0x4   :  { %s32_s19 = sshll.u32 %s251_s18, 4  ;;  %s252_s23 = smov [#allocation2]   ;;  %s33_s19 = int_to_ptr.vmem [resolvable:$true] %s32_s19 }
   0x5   :  { %35 = dma.hbm_to_vmem [thread:$0]  %s31_s17, 64, %s33_s19, [#allocation6]  }
   0x6   :  { %s21_s24 = sshll.u32 %s252_s23, 4  ;;  %s41_s27 = sshll.u32 %s298_s2, 4  ;;  %s22_s24 = int_to_ptr.vmem [resolvable:$true] %s21_s24  ;;  %s42_s27 = int_to_ptr.hbm [resolvable:$true] %s41_s27 }
   0x7   :  { %24 = dma.hbm_to_vmem [thread:$0]  %s20_s22, 64, %s22_s24, [#allocation3]  }
   0x8   :  { %s253_s1 = smov [#allocation7]  }
   0x9   :  { %s43_s28 = sshll.u32 %s253_s1, 4  ;;  %s44_s28 = int_to_ptr.vmem [resolvable:$true] %s43_s28 }
   0xa   :  { %46 = dma.hbm_to_vmem [thread:$0]  %s42_s27, 64, %s44_s28, [#allocation6]  }
   0xb   :  { %243 = dma.done.wait [#allocation3], 64  }
   0xc   :  { %244 = vsyncadd [#allocation3], 4294967232 }
   0xd   :  { %245 = dma.done.wait [#allocation6], 128  }
   0xe   :  { %246 = vsyncadd [#allocation6], 4294967168  ;;  %vm65_vm0 = vcmask 1043456   ;;  %v59_v0 = vld [vmem:[#allocation2] sm:$0xf]  ;;  %s254_s0 = smov [#allocation9]  }
   0xf   :  { %v60_v1 = vld [vmem:[#allocation5] sm:$0xf]  ;;  %v63_v2 = vld [vmem:[#allocation7] sm:$0xf]  ;;  %s100_s2 = sshll.u32 %s254_s0, 4  ;;  %s102_s5 = sshll.u32 %s300_s4, 4  ;;  %s101_s2 = int_to_ptr.vmem [resolvable:$true] %s100_s2  ;;  %s103_s5 = int_to_ptr.hbm [resolvable:$true] %s102_s5 }
  0x10   :  { %v61_v3 = vsub.f32 %v59_v0, %v60_v1  ;;  %v73_v4 = vsel %vm65_vm0, %v63_v2, 0.0  ;;  %s255_s6 = smov [#allocation8]   ;;  %s91_s10 = sshll.u32 %s299_s3, 4  ;;  %s92_s10 = int_to_ptr.hbm [resolvable:$true] %s91_s10 }
  0x11   :  { %v74_v5 = vrot.slane %v73_v4, 4  ;;  %s89_s7 = sshll.u32 %s255_s6, 4  ;;  %s90_s7 = int_to_ptr.vmem [resolvable:$true] %s89_s7 }
  0x12   :  { %v62_v6 = vmul.f32 %v61_v3, %v61_v3 }
  0x13   :  { %v75_v7 = vadd.f32 %v74_v5, %v73_v4 }
  0x14   :  { %v64_v8 = vmul.f32 %v63_v2, %v62_v6 }
  0x15   :  { %v76_v9 = vrot.slane %v75_v7, 2 }
  0x16   :  { %v66_v10 = vsel %vm65_vm0, %v64_v8, 0.0 }
  0x17   :  { %v67_v11 = vrot.slane %v66_v10, 4  ;;  %v77_v12 = vadd.f32 %v76_v9, %v75_v7 }
  0x19   :  { %v68_v13 = vadd.f32 %v67_v11, %v66_v10  ;;  %v78_v14 = vrot.slane %v77_v12, 1 }
  0x1b   :  { %v69_v15 = vrot.slane %v68_v13, 2  ;;  %v79_v16 = vadd.f32 %v78_v14, %v77_v12 }
  0x1d   :  { %v70_v17 = vadd.f32 %v69_v15, %v68_v13  ;;  %83 = vst [vmem:[#allocation9] sm:$0x1] %v79_v16 }
  0x1e   :  { %105 = dma.vmem_to_hbm [thread:$0]  %s101_s2, 16, %s103_s5, [#allocation10]  }
  0x1f   :  { %v71_v18 = vrot.slane %v70_v17, 1 }
  0x21   :  { %v72_v19 = vadd.f32 %v71_v18, %v70_v17 }
  0x23   :  { %82 = vst [vmem:[#allocation8] sm:$0x1] %v72_v19 }
  0x24   :  { %94 = dma.vmem_to_hbm [thread:$0]  %s90_s7, 16, %s92_s10, [#allocation4]  }
  0x25   :  { %247 = dma.done.wait [#allocation4], 16  }
  0x26   :  { %248 = vsyncadd [#allocation4], 4294967280 }
  0x27   :  { %249 = dma.done.wait [#allocation10], 16  }
  0x28   :  { %250 = vsyncadd [#allocation10], 4294967280 }
  0x29   :  { %114 = vsyncpa [#allocation3], 1 }
  0x2a   :  { %115 = vsyncpa [#allocation6], 1 }
  0x2b   :  { %116 = vsyncpa [#allocation4], 1 }
  0x2c   :  { %117 = vsyncpa [#allocation10], 1 }

</bundles_post_ra>
